<compile_context>
chip_gen: v7x
topology: tpu7x:2x2x1
jax: 0.10.0
libtpu: 0.0.40
codegen_flags: <defaults>
</compile_context>

<pallas_src>
import jax
import jax.numpy as jnp
from jax.experimental import pallas as pl
from jax.experimental.pallas import tpu as pltpu


def _round_up(x, m):
    return (x + m - 1) // m * m


def _upsample_mm_kernel(x_ref, e_ref, o_ref):
    # (TM, L) @ (L, L*s) -> (TM, L*s).  E is a 0/1 expansion matrix, so with HIGHEST
    # precision this is an exact nearest-neighbour copy of the input values.
    o_ref[...] = jnp.dot(
        x_ref[...],
        e_ref[...],
        precision=jax.lax.Precision.HIGHEST,
        preferred_element_type=jnp.float32,
    ).astype(o_ref.dtype)


def upsample_nearest_last_dim(x, expand_mat, *, row_tile=128):
    """Nearest-neighbour upsample of the last dim, computed as x @ expand_mat."""
    *lead, L = x.shape
    Lo = expand_mat.shape[1]

    rows = 1
    for d in lead:
        rows *= d
    x2 = x.reshape(rows, L)

    # Row tile: multiple of 8 sublanes; pad rows so the grid divides evenly
    # (padded rows are zeros and are sliced off after the kernel).
    tm = min(row_tile, _round_up(rows, 8))
    rows_pad = _round_up(rows, tm)
    if rows_pad != rows:
        x2 = jnp.pad(x2, ((0, rows_pad - rows), (0, 0)))

    out = pl.pallas_call(
        _upsample_mm_kernel,
        out_shape=jax.ShapeDtypeStruct((rows_pad, Lo), x.dtype),
        grid=(rows_pad // tm,),
        in_specs=[
            pl.BlockSpec((tm, L), lambda i: (i, 0)),     # row tile of the input
            pl.BlockSpec((L, Lo), lambda i: (0, 0)),     # expansion matrix: resident
        ],
        out_specs=pl.BlockSpec((tm, Lo), lambda i: (i, 0)),  # lane-dense output tile
        compiler_params=pltpu.CompilerParams(
            dimension_semantics=("parallel",),           # megacore-shardable on v7x
        ),
    )(x2, expand_mat.astype(x.dtype))

    if rows_pad != rows:
        out = out[:rows]
    return out.reshape(*lead, Lo)


class UpsampleLayer:
    """Mirrors torch.nn.Upsample(scale_factor=s) on (N, C, L) input, mode='nearest'."""

    def __init__(self, input_len, scale_factor):
        if int(scale_factor) != scale_factor:
            # TODO(synk): fractional scale factors (PyTorch recompute_scale_factor path).
            raise ValueError("integer scale_factor expected")
        s = int(scale_factor)
        self.input_len = input_len
        self.scale_factor = s
        self.output_len = input_len * s

        # Precompute the 0/1 expansion matrix once ("weights at init"):
        # E[j, i] = 1  iff  i // s == j   =>   (x @ E)[:, i] = x[:, i // s].
        src = jnp.arange(self.output_len, dtype=jnp.int32) // s
        row = jnp.arange(input_len, dtype=jnp.int32)
        self.expand = (src[None, :] == row[:, None]).astype(jnp.float32)  # (L, L*s)

    def __call__(self, x):
        # Upsamples the last (length) dim; works for (N, C, L) or any leading dims.
        # TODO(synk): 4D/5D spatial Upsample (scales H and W) is not implemented here.
        assert x.shape[-1] == self.input_len, (x.shape, self.input_len)
        return upsample_nearest_last_dim(x, self.expand)


if __name__ == "__main__":
    key = jax.random.PRNGKey(0)

    # (batch=4, channels=64, length=64), scale_factor=4  ->  (4, 64, 256)
    # rows = 4*64 = 256  ->  grid of 2 row tiles of 128; output last dim 256 (lane-dense).
    B, C, L, S = 4, 64, 64, 4
    x = jax.random.normal(key, (B, C, L), jnp.float32)

    layer = UpsampleLayer(input_len=L, scale_factor=S)
    out = jax.block_until_ready(layer(x))

    assert out.shape == (B, C, layer.output_len), out.shape
    ref = jnp.repeat(x, S, axis=-1)  # torch.nn.Upsample(scale_factor=S) 'nearest' reference
    assert bool(jnp.allclose(out, ref, atol=1e-5, rtol=1e-5)), float(
        jnp.max(jnp.abs(out - ref))
    )
    assert bool(jnp.all(jnp.isfinite(out)))
    print("KERNEL_OK")
</pallas_src>

<mosaic_0001>
module attributes {stable_mosaic.version = 11 : i64} {
  func.func @_upsample_mm_kernel(%arg0: i32, %arg1: memref<128x64xf32, #tpu.memory_space<vmem>>, %arg2: memref<64x256xf32, #tpu.memory_space<vmem>>, %arg3: memref<128x256xf32, #tpu.memory_space<vmem>>) attributes {dimension_semantics = [#tpu.dimension_semantics<parallel>], iteration_bounds = array<i64: 2>, scalar_prefetch = 0 : i64, scratch_operands = 0 : i64, tpu.core_type = #tpu.core_type<tc>, window_params = [{transform_indices = @transform_0, window_bounds = array<i64: 128, 64>}, {pipeline_mode = #tpu.pipeline_mode<synchronous>, transform_indices = @transform_1, window_bounds = array<i64: 64, 256>}, {transform_indices = @transform_2, window_bounds = array<i64: 128, 256>}]} {
    %c0 = arith.constant 0 : index
    %c0_0 = arith.constant 0 : index
    %0 = vector.load %arg1[%c0, %c0_0] : memref<128x64xf32, #tpu.memory_space<vmem>>, vector<128x64xf32>
    %c0_1 = arith.constant 0 : index
    %c0_2 = arith.constant 0 : index
    %1 = vector.load %arg2[%c0_1, %c0_2] : memref<64x256xf32, #tpu.memory_space<vmem>>, vector<64x256xf32>
    %cst = arith.constant dense<0.000000e+00> : vector<128x256xf32>
    %2 = tpu.matmul %0, %1, %cst {dimension_numbers = #tpu.dot_dimension_numbers<[1], [0], [0], [1], [0, 0, 1, 1], [], []>, precision = #tpu.contract_precision<fp32>} : vector<128x64xf32>, vector<64x256xf32>, vector<128x256xf32> -> vector<128x256xf32>
    %c0_3 = arith.constant 0 : index
    %c0_4 = arith.constant 0 : index
    %3 = vector.load %arg3[%c0_3, %c0_4] : memref<128x256xf32, #tpu.memory_space<vmem>>, vector<128x256xf32>
    tpu.vector_store %arg3[%c0_3, %c0_4], %2 {strides = array<i32>} : memref<128x256xf32, #tpu.memory_space<vmem>>, vector<128x256xf32>,
    return
  }
  func.func @transform_0(%arg0: i32) -> (i32, i32) {
    %c0_i32 = arith.constant 0 : i32
    %c0_i32_0 = arith.constant 0 : i32
    return %arg0, %c0_i32 : i32, i32
  }
  func.func @transform_1(%arg0: i32) -> (i32, i32) {
    %c0_i32 = arith.constant 0 : i32
    %c0_i32_0 = arith.constant 0 : i32
    %c0_i32_1 = arith.constant 0 : i32
    return %c0_i32, %c0_i32_0 : i32, i32
  }
  func.func @transform_2(%arg0: i32) -> (i32, i32) {
    %c0_i32 = arith.constant 0 : i32
    %c0_i32_0 = arith.constant 0 : i32
    return %arg0, %c0_i32 : i32, i32
  }
}

</mosaic_0001>

<bundles_post_ra>
// kernel: tpu_custom_call.1
= control target key start
LH: loop header
LB: loop body
LE: loop exit
PB: predicated region body
PF: predicated region fallthrough
CT: control target
= control target key end

     0   :  { %7 = vsyncpa [#allocation3], 0  ;;  %s2797_s0 = inlined_call_operand.vmem [shape: f32[256,64], index: 0, kind: input, shape index: {}]   ;;  %s2798_s1 = inlined_call_operand.vmem [shape: f32[64,256], index: 1, kind: input, shape index: {}]   ;;  %s2799_s2 = inlined_call_operand.hbm [shape: f32[256,256], index: 2, kind: output, shape index: {}]  }
   0x1   :  { %9 = vsyncpa [#allocation3 + $0x1], 0  ;;  %s2113_s9 = smov 0   ;;  %s2115_s10 = smov 0  }
   0x2   :  { %s2117_s11 = smov 0   ;;  %s2119_s12 = smov 0  }
   0x3 LB: > { %s2134_s13 = sadd.s32 4294967295, %s2092_s12   ;;  %s1717_s14 = sadd.s32 4294967294, %s2092_s12   ;;  %s2092_s12 = sphi %s2119_s12, %s2828_s12   ;;  %s2088_s11 = sphi %s2117_s11, %s2827_s11   ;;  %s2084_s10 = sphi %s2115_s10, %s2826_s10   ;;  %s2080_s9 = sphi %s2113_s9, %s2825_s9  }
   0x4   : > { %s2138_s15 = sadd.s32 1, %s2092_s12   ;;  %s69_s16 = sadd.s32 1, %s2088_s11 }
   0x5   : > { %s66_s17 = ssub.s32 %s2092_s12, %s2138_s15  ;;  %p79_p0 = scmp.ne.s32.totalorder %s2088_s11, %s2084_s10 }
   0x6   : > { %p67_p1 = scmp.eq.s32.totalorder %s66_s17, 0  ;;  %p80_p2 = scmp.eq.s32.totalorder %s2134_s13, 1 }
   0x7   : > { %p85_p3 = scmp.ne.s32.totalorder %s2084_s10, %s2080_s9  ;;  %p86_p4 = scmp.eq.s32.totalorder %s1717_s14, 1 }
   0x8   : > { %s2149_s18 = scalar_select %p67_p1, %s2088_s11, %s69_s16  }
   0x9   : > { %p2151_p5 = por %p80_p2, %p79_p0  ;;  %p2155_p6 = por %p86_p4, %p85_p3 }
   0xa   : > { %p1720_p7 = scmp.ge.s32.totalorder %s2092_s12, 1  ;;  %p116_p8 = scmp.lt.s32.totalorder %s2092_s12, 3 }
   0xc   : > { %p117_p9 = pnand %p1720_p7, %p116_p8 }
   0xe   : > { %120 = sbr.rel (%p117_p9) target bundleno = 460 (0x1cc), region = 28 }
  0x15   : > { %v162_v0 = vld [vmem:[%s2798_s1 + $0x8] sm:$0xff]  ;;  %v164_v1 = vld [vmem:[%s2798_s1 + $0x18] sm:$0xff]  ;;  %v161_v2 = vld [vmem:[%s2798_s1] sm:$0xff]  ;;  %s1722_s27 = sshll.u32 %s2134_s13, 4  ;;  %v2803_v9 = vmov 0.0   ;;  %vm177_vm0 = vcmask 523264  }
  0x16   : > { %v226_v3 = vand.u32 4294901760, %v162_v0  ;;  %v230_v4 = vand.u32 4294901760, %v164_v1  ;;  %v163_v5 = vld [vmem:[%s2798_s1 + $0x10] sm:$0xff]  ;;  %v228_v6 = vand.u32 4294901760, %v161_v2  ;;  %v166_v7 = vld [vmem:[%s2798_s1 + $0x28] sm:$0xff]  ;;  %v168_v8 = vld [vmem:[%s2798_s1 + $0x38] sm:$0xff]  ;;  %306 = vmatprep.mubr.f32.mxu1 %v2803_v9  ;;  %1045 = vmatprep.mubr.f32.mxu0 %v2803_v9 }
  0x17   : > { %v232_v10 = vand.u32 4294901760, %v163_v5  ;;  %v234_v11 = vand.u32 4294901760, %v166_v7  ;;  %v238_v12 = vand.u32 4294901760, %v168_v8  ;;  %v165_v13 = vld [vmem:[%s2798_s1 + $0x20] sm:$0xff]  ;;  %v167_v14 = vld [vmem:[%s2798_s1 + $0x30] sm:$0xff]  ;;  %v170_v15 = vld [vmem:[%s2798_s1 + $0x48] sm:$0xff] }
  0x18   : > { %v2191_v16 = vpack.c.bf16 %v230_v4, %v226_v3  ;;  %v172_v17 = vld [vmem:[%s2798_s1 + $0x58] sm:$0xff]  ;;  %v2199_v18 = vld [vmem:[%s2798_s1 + $0x40] sm:$0xff]  ;;  %v2204_v19 = vld [vmem:[%s2798_s1 + $0x50] sm:$0xff]  ;;  %p139_p10 = scmp.lt.s32.totalorder %s1722_s27, 31  ;;  %v2223_v24 = vsub.f32 %v162_v0, %v226_v3  ;;  %v236_v25 = vand.u32 4294901760, %v165_v13  ;;  %v240_v26 = vand.u32 4294901760, %v167_v14 }
  0x19   : > { %v2208_v20 = vpack.c.bf16 %v232_v10, %v228_v6  ;;  %v2210_v21 = vpack.c.bf16 %v238_v12, %v234_v11  ;;  %v2215_v22 = vld [vmem:[%s2798_s1 + $0x68] sm:$0xff]  ;;  %v2220_v23 = vld [vmem:[%s2798_s1 + $0x78] sm:$0xff]  ;;  %v242_v27 = vand.u32 4294901760, %v170_v15  ;;  %v246_v28 = vand.u32 4294901760, %v172_v17  ;;  %v2245_v36 = vld [vmem:[%s2798_s1 + $0x60] sm:$0xff]  ;;  %s1731_s23 = sshll.u32 %s2134_s13, 12 }
  0x1a   : > { %1733 = vmatprep.subr.bf16.mxu1 %v2191_v16  ;;  %1781 = vmatprep.subr.bf16.mxu0 %v2191_v16  ;;  %s2830_s27 = smov (!%p139_p10, %s1722_s27), 31  ;;  %v244_v29 = vand.u32 4294901760, %v2199_v18  ;;  %v248_v30 = vand.u32 4294901760, %v2204_v19  ;;  %v250_v31 = vand.u32 4294901760, %v2215_v22  ;;  %v2233_v32 = vsub.f32 %v164_v1, %v230_v4  ;;  %v2250_v37 = vld [vmem:[%s2798_s1 + $0x70] sm:$0xff]  ;;  %s2748_s28 = scalar_lea.hbm %s2799_s2, %s1731_s23 }
  0x1b   : > { %1735 = vmatpush1.bf16.msra.mxu1 %v2208_v20  ;;  %1783 = vmatpush1.bf16.msra.mxu0 %v2208_v20  ;;  %v2235_v33 = vsub.f32 %v161_v2, %v228_v6  ;;  %v2239_v34 = vpack.c.bf16 %v240_v26, %v236_v25  ;;  %v254_v35 = vand.u32 4294901760, %v2220_v23  ;;  %s1723_s8 = sshll.u32 %s2830_s27, 3  ;;  %v2252_v38 = vsub.f32 %v163_v5, %v232_v10  ;;  %s135_s27 = sand.u32 1, %s2084_s10  }
  0x1c   : > { %1737 = vmatprep.subr.bf16.mxu1 %v2210_v21  ;;  %1785 = vmatprep.subr.bf16.mxu0 %v2210_v21  ;;  %v2254_v39 = vsub.f32 %v166_v7, %v234_v11  ;;  %v2256_v40 = vpack.c.bf16 %v246_v28, %v242_v27  ;;  %s2261_s17 = scalar_lea.vmem %s2797_s0, %s1723_s8  ;;  %v2263_v41 = vsub.f32 %v168_v8, %v238_v12  ;;  %v2802_v47 = vand.u32 4294901760, %v2245_v36  ;;  %s1721_s21 = sshll.u32 %s135_s27, 8 }
  0x1d   : > { %v2265_v42 = vsub.f32 %v165_v13, %v236_v25  ;;  %v2267_v43 = vsub.f32 %v167_v14, %v240_v26  ;;  %v2273_v44 = vpack.c.bf16 %v248_v30, %v244_v29  ;;  %v145_v45 = vld [vmem:[%s2261_s17] sm:$0xff]  ;;  %v2282_v46 = vpack.c.bf16 %v254_v35, %v250_v31  ;;  %v146_v54 = vld [vmem:[%s2261_s17 + $0x8] sm:$0xff]  ;;  %v147_v63 = vld [vmem:[%s2261_s17 + $0x10] sm:$0xff]  ;;  %s2711_s22 = scalar_lea.vmem [#allocation2], %s1721_s21  ;;  %s2756_s13 = scalar_lea.sflag [#allocation3], %s135_s27 }
  0x1e   : > { %v2800_v48 = vand.u32 4294901760, %v2250_v37  ;;  %v179_v49 = vsel %vm177_vm0, %v145_v45, 0  ;;  %v485_v51 = vand.u32 4294901760, %v2223_v24  ;;  %v497_v52 = vand.u32 4294901760, %v2233_v32  ;;  %v148_v0 = vld [vmem:[%s2261_s17 + $0x18] sm:$0xff]  ;;  %v149_v10 = vld [vmem:[%s2261_s17 + $0x20] sm:$0xff] }
  0x1f   : > { %1739 = vmatpush1.bf16.msra.mxu1 %v2239_v34  ;;  %1787 = vmatpush1.bf16.msra.mxu0 %v2239_v34  ;;  %v2289_v50 = vand.u32 4294901760, %v179_v49  ;;  %v491_v53 = vand.u32 4294901760, %v2235_v33  ;;  %v2295_v55 = vsub.f32 %v170_v15, %v242_v27  ;;  %v2297_v56 = vsub.f32 %v172_v17, %v246_v28  ;;  %s1655_s24 = sshll.u32 %s2711_s22, 4  ;;  %s2095_s30 = smov [#allocation2]   ;;  %s2750_s24 = int_to_ptr.vmem [resolvable:$true] %s1655_s24 }
  0x20   : > { %1741 = vmatprep.subr.bf16.mxu1 %v2256_v40  ;;  %1789 = vmatprep.subr.bf16.mxu0 %v2256_v40  ;;  %v2303_v57 = vpack.c.bf16 %v2800_v48, %v2802_v47  ;;  %v503_v58 = vand.u32 4294901760, %v2252_v38  ;;  %v486_v60 = vsub.f32 %v2223_v24, %v485_v51  ;;  %v498_v61 = vsub.f32 %v2233_v32, %v497_v52  ;;  %v154_v47 = vld [vmem:[%s2261_s17 + $0x48] sm:$0xff]  ;;  %s2030_s29 = scalar_lea.vmem %s2750_s24, 4096  ;;  %s2034_s3 = sshll.u32 %s2095_s30, 4  ;;  %s2035_s3 = int_to_ptr.vmem [resolvable:$false] %s2034_s3 }
  0x21   : > { %v2307_v59 = vsub.f32 %v179_v49, %v2289_v50  ;;  %v1796_v62 = vpack.c.bf16 %v497_v52, %v485_v51  ;;  %v492_v1 = vsub.f32 %v2235_v33, %v491_v53  ;;  %v182_v4 = vsel %vm177_vm0, %v146_v54, 0  ;;  %p2031_p11 = scmp.ne.s32.totalorder %s2750_s24, %s2030_s29  ;;  %s2036_s4 = scalar_lea.vmem %s2035_s3, 8192 }
  0x22   : > { %v504_v2 = vsub.f32 %v2252_v38, %v503_v58  ;;  %v1798_v3 = vpack.c.bf16 %v503_v58, %v491_v53  ;;  %v487_v6 = vand.u32 4294901760, %v486_v60  ;;  %v499_v7 = vand.u32 4294901760, %v498_v61  ;;  %p2037_p0 = scmp.lt.s32.totalorder %s2750_s24, %s2035_s3  ;;  %p2038_p1 = scmp.lt.s32.totalorder %s2036_s4, %s2030_s29 }
  0x23   : > { %1743 = vmatpush1.bf16.msra.mxu1 %v2273_v44  ;;  %1791 = vmatpush1.bf16.msra.mxu0 %v2273_v44  ;;  %v309_v5 = vand.u32 4294901760, %v2307_v59  ;;  %v2321_v8 = vand.u32 4294901760, %v182_v4  ;;  %v493_v11 = vand.u32 4294901760, %v492_v1  ;;  %v185_v13 = vsel %vm177_vm0, %v147_v63, 0  ;;  %p2032_p12 = pnand %p2031_p11, %p2151_p5 }
  0x24   : > { %1745 = vmatprep.subr.bf16.mxu1 %v2282_v46  ;;  %1793 = vmatprep.subr.bf16.mxu0 %v2282_v46  ;;  %v505_v12 = vand.u32 4294901760, %v504_v2  ;;  %v188_v14 = vsel %vm177_vm0, %v148_v0, 0  ;;  %v1748_v17 = vpack.c.bf16 %v499_v7, %v487_v6  ;;  %v2330_v26 = vand.u32 4294901760, %v185_v13  ;;  %p2039_p2 = por %p2038_p1, %p2037_p0 }
  0x25   : > { %v310_v15 = vsub.f32 %v2307_v59, %v309_v5  ;;  %v2328_v25 = vsub.f32 %v182_v4, %v2321_v8  ;;  %v2334_v28 = vand.u32 4294901760, %v188_v14  ;;  %v191_v45 = vsel %vm177_vm0, %v149_v10, 0  ;;  %v150_v10 = vld [vmem:[%s2261_s17 + $0x28] sm:$0xff]  ;;  %p2033_p13 = pneg %p2032_p12 }
  0x26   : > { %v1750_v27 = vpack.c.bf16 %v505_v12, %v493_v11  ;;  %v509_v49 = vand.u32 4294901760, %v2254_v39  ;;  %v2340_v53 = vsub.f32 %v185_v13, %v2330_v26  ;;  %v2342_v54 = vand.u32 4294901760, %v191_v45 }
  0x27   : > { %1747 = vmatpush1.bf16.msra.mxu1 %v2303_v57  ;;  %1795 = vmatpush1.bf16.msra.mxu0 %v2303_v57  ;;  %v311_v51 = vand.u32 4294901760, %v310_v15  ;;  %v320_v52 = vand.u32 4294901760, %v2328_v25  ;;  %v2345_v58 = vsub.f32 %v188_v14, %v2334_v28  ;;  %v521_v61 = vand.u32 4294901760, %v2263_v41  ;;  %p2040_p3 = pnand %p2039_p2, %p2033_p13 }
  0x28   : > { %1749 = vmatprep.subr.bf16.mxu1 %v1748_v17  ;;  %1797 = vmatprep.subr.bf16.mxu0 %v1796_v62  ;;  %v510_v60 = vsub.f32 %v2254_v39, %v509_v49  ;;  %v515_v63 = vand.u32 4294901760, %v2265_v42  ;;  %v331_v0 = vand.u32 4294901760, %v2340_v53  ;;  %v2353_v1 = vsub.f32 %v191_v45, %v2342_v54  ;;  %v151_v45 = vld [vmem:[%s2261_s17 + $0x30] sm:$0xff] }
  0x29   : > { %2811 = vst [vmem:[#allocation5_spill] sm:$0xff] %v2345_v58  ;;  %v321_v62 = vsub.f32 %v2328_v25, %v320_v52  ;;  %v527_v2 = vand.u32 4294901760, %v2267_v43  ;;  %v342_v4 = vand.u32 4294901760, %v2345_v58  ;;  %v522_v7 = vsub.f32 %v2263_v41, %v521_v61 }
  0x2a   : > { %312 = vmatmul.mubr.f32.vlgmr.msra.gmra.mrb[0].mxu1 %v311_v51  ;;  %1049 = vmatmul.mubr.f32.vlgmr.msra.gmra.mrb[0].mxu0 %v309_v5  ;;  %2812 = vst [vmem:[#allocation6_spill] sm:$0xff] %v2353_v1  ;;  %v511_v6 = vand.u32 4294901760, %v510_v60  ;;  %v1800_v5 = vpack.c.bf16 %v521_v61, %v509_v49  ;;  %v332_v12 = vsub.f32 %v2340_v53, %v331_v0  ;;  %v2801_v13 = vand.u32 4294901760, %v2353_v1  ;;  %v152_v49 = vld [vmem:[%s2261_s17 + $0x38] sm:$0xff]  ;;  %v153_v51 = vld [vmem:[%s2261_s17 + $0x40] sm:$0xff] }
  0x2b   : > { %1751 = vmatpush1.bf16.msra.mxu1 %v1750_v27  ;;  %1799 = vmatpush1.bf16.msra.mxu0 %v1798_v3  ;;  %v322_v11 = vand.u32 4294901760, %v321_v62  ;;  %v516_v3 = vsub.f32 %v2265_v42, %v515_v63  ;;  %v2367_v14 = vsub.f32 %v2199_v18, %v244_v29  ;;  %v523_v15 = vand.u32 4294901760, %v522_v7 }
  0x2c   : > { %317 = vmatprep.mubr.f32.mxu1 %v2803_v9  ;;  %1054 = vmatprep.mubr.f32.mxu0 %v2803_v9  ;;  %v528_v17 = vsub.f32 %v2267_v43, %v527_v2  ;;  %v1802_v27 = vpack.c.bf16 %v527_v2, %v515_v63  ;;  %v333_v60 = vand.u32 4294901760, %v332_v12  ;;  %v343_v61 = vsub.f32 %v2345_v58, %v342_v4 }
  0x2d   : > { %1801 = vmatprep.subr.bf16.mxu0 %v1800_v5  ;;  %v517_v62 = vand.u32 4294901760, %v516_v3  ;;  %v194_v48 = vsel %vm177_vm0, %v150_v10, 0  ;;  %v2378_v18 = vsub.f32 %v2204_v19, %v248_v30  ;;  %v1752_v29 = vpack.c.bf16 %v523_v15, %v511_v6 }
  0x2e   : > { %323 = vmatmul.mubr.f32.gmra.mrb[2].mxu1 %v322_v11  ;;  %1058 = vmatmul.mubr.f32.gmra.mrb[2].mxu0 %v320_v52  ;;  %v529_v63 = vand.u32 4294901760, %v528_v17  ;;  %v2382_v2 = vand.u32 4294901760, %v194_v48  ;;  %v354_v52 = vsub.f32 %v2353_v1, %v2801_v13  ;;  %v197_v7 = vsel %vm177_vm0, %v151_v45, 0 }
  0x2f   : > { %328 = vmatprep.mubr.f32.mxu1 %v2803_v9  ;;  %1063 = vmatprep.mubr.f32.mxu0 %v2803_v9  ;;  %v200_v5 = vsel %vm177_vm0, %v152_v49, 0  ;;  %v203_v19 = vsel %vm177_vm0, %v153_v51, 0  ;;  %v2393_v6 = vand.u32 4294901760, %v197_v7  ;;  %v344_v12 = vand.u32 4294901760, %v343_v61 }
  0x30   : > { %1803 = vmatpush1.bf16.msra.mxu0 %v1802_v27  ;;  %1753 = vmatprep.subr.bf16.mxu1 %v1752_v29  ;;  %v1754_v30 = vpack.c.bf16 %v529_v63, %v517_v62  ;;  %v2391_v10 = vsub.f32 %v194_v48, %v2382_v2  ;;  %v2395_v11 = vand.u32 4294901760, %v200_v5  ;;  %v533_v3 = vand.u32 4294901760, %v2295_v55 }
  0x31   : > { %v545_v15 = vand.u32 4294901760, %v2297_v56  ;;  %v539_v17 = vand.u32 4294901760, %v2367_v14  ;;  %v2404_v27 = vsub.f32 %v197_v7, %v2393_v6  ;;  %v2406_v45 = vand.u32 4294901760, %v203_v19 }
  0x32   : > { %2813 = vst [vmem:[#allocation7_spill] sm:$0xff] %v2391_v10  ;;  %334 = vmatmul.mubr.f32.gmra.mrb[4].mxu1 %v333_v60  ;;  %1067 = vmatmul.mubr.f32.gmra.mrb[4].mxu0 %v331_v0  ;;  %v364_v48 = vand.u32 4294901760, %v2391_v10  ;;  %v551_v0 = vand.u32 4294901760, %v2378_v18  ;;  %v2410_v49 = vsub.f32 %v200_v5, %v2395_v11  ;;  %v534_v51 = vsub.f32 %v2295_v55, %v533_v3 }
  0x33   : > { %339 = vmatprep.mubr.f32.mxu1 %v2803_v9  ;;  %1072 = vmatprep.mubr.f32.mxu0 %v2803_v9  ;;  %2814 = vst [vmem:[#allocation8_spill] sm:$0xff] %v2404_v27  ;;  %v546_v60 = vsub.f32 %v2297_v56, %v545_v15  ;;  %v1804_v61 = vpack.c.bf16 %v545_v15, %v533_v3  ;;  %v355_v62 = vand.u32 4294901760, %v354_v52  ;;  %v375_v7 = vand.u32 4294901760, %v2404_v27 }
  0x34   : > { %1755 = vmatpush1.bf16.msra.mxu1 %v1754_v30  ;;  %v365_v29 = vsub.f32 %v2391_v10, %v364_v48  ;;  %v540_v63 = vsub.f32 %v2367_v14, %v539_v17  ;;  %v535_v13 = vand.u32 4294901760, %v534_v51  ;;  %v552_v5 = vsub.f32 %v2378_v18, %v551_v0 }
  0x35   : > { %v547_v30 = vand.u32 4294901760, %v546_v60  ;;  %v2422_v9 = vsub.f32 %v2215_v22, %v250_v31  ;;  %v2427_v52 = vsub.f32 %v2220_v23, %v254_v35  ;;  %1805 = vmatprep.subr.bf16.mxu0 %v1804_v61  ;;  %v1806_v31 = vpack.c.bf16 %v551_v0, %v539_v17  ;;  %v155_v60 = vld [vmem:[%s2261_s17 + $0x50] sm:$0xff] }
  0x36   : > { %345 = vmatmul.mubr.f32.gmra.mrb[6].mxu1 %v344_v12  ;;  %1076 = vmatmul.mubr.f32.gmra.mrb[6].mxu0 %v342_v4  ;;  %v2815_v12 = vmov 0.0   ;;  %v2432_v4 = vsub.f32 %v203_v19, %v2406_v45  ;;  %v541_v3 = vand.u32 4294901760, %v540_v63  ;;  %v553_v22 = vand.u32 4294901760, %v552_v5 }
  0x37   : > { %350 = vmatprep.mubr.f32.mxu1 %v2815_v12  ;;  %1081 = vmatprep.mubr.f32.mxu0 %v2815_v12  ;;  %v1756_v51 = vpack.c.bf16 %v547_v30, %v535_v13  ;;  %v2816_v10 = vand.u32 4294901760, %v2245_v36  ;;  %v206_v35 = vsel %vm177_vm0, %v154_v47, 0  ;;  %v2817_v19 = vand.u32 4294901760, %v2353_v1  ;;  %v156_v47 = vld [vmem:[%s2261_s17 + $0x58] sm:$0xff] }
  0x38   : > { %v366_v63 = vand.u32 4294901760, %v365_v29  ;;  %v376_v15 = vsub.f32 %v2404_v27, %v375_v7  ;;  %v1758_v13 = vpack.c.bf16 %v553_v22, %v541_v3  ;;  %v2445_v61 = vand.u32 4294901760, %v206_v35  ;;  %1807 = vmatpush1.bf16.msra.mxu0 %v1806_v31 }
  0x39   : > { %v2439_v23 = vsub.f32 %v2245_v36, %v2816_v10  ;;  %v2818_v17 = vand.u32 4294901760, %v2250_v37  ;;  %v209_v36 = vsel %vm177_vm0, %v155_v60, 0  ;;  %v557_v10 = vand.u32 4294901760, %v2422_v9  ;;  %1757 = vmatprep.subr.bf16.mxu1 %v1756_v51  ;;  %v157_v51 = vld [vmem:[%s2261_s17 + $0x60] sm:$0xff] }
  0x3a   : > { %356 = vmatmul.mubr.f32.gmra.mrb[8].mxu1 %v355_v62  ;;  %1085 = vmatmul.mubr.f32.gmra.mrb[8].mxu0 %v2817_v19  ;;  %v569_v62 = vand.u32 4294901760, %v2427_v52  ;;  %v2819_v29 = vand.u32 4294901760, %v2410_v49  ;;  %v397_v5 = vand.u32 4294901760, %v2432_v4  ;;  %v377_v19 = vand.u32 4294901760, %v376_v15 }
  0x3b   : > { %v2450_v0 = vsub.f32 %v2250_v37, %v2818_v17  ;;  %361 = vmatprep.mubr.f32.mxu1 %v2815_v12  ;;  %1090 = vmatprep.mubr.f32.mxu0 %v2815_v12  ;;  %v558_v37 = vsub.f32 %v2422_v9, %v557_v10  ;;  %v563_v60 = vand.u32 4294901760, %v2439_v23  ;;  %v2466_v17 = vsub.f32 %v206_v35, %v2445_v61 }
  0x3c   : > { %v387_v30 = vsub.f32 %v2410_v49, %v2819_v29  ;;  %1759 = vmatpush1.bf16.msra.mxu1 %v1758_v13  ;;  %v570_v3 = vsub.f32 %v2427_v52, %v569_v62  ;;  %v1808_v22 = vpack.c.bf16 %v569_v62, %v557_v10  ;;  %v2468_v29 = vand.u32 4294901760, %v209_v36 }
  0x3d   : > { %v212_v27 = vsel %vm177_vm0, %v156_v47, 0  ;;  %v559_v31 = vand.u32 4294901760, %v558_v37  ;;  %v564_v10 = vsub.f32 %v2439_v23, %v563_v60  ;;  %v398_v15 = vsub.f32 %v2432_v4, %v397_v5 }
  0x3e   : > { %367 = vmatmul.mubr.f32.gmra.mrb[10].mxu1 %v366_v63  ;;  %1094 = vmatmul.mubr.f32.gmra.mrb[10].mxu0 %v364_v48  ;;  %v571_v13 = vand.u32 4294901760, %v570_v3  ;;  %v575_v63 = vand.u32 4294901760, %v2450_v0  ;;  %v388_v48 = vand.u32 4294901760, %v387_v30  ;;  %v408_v58 = vand.u32 4294901760, %v2466_v17 }
  0x3f   : > { %372 = vmatprep.mubr.f32.mxu1 %v2815_v12  ;;  %1099 = vmatprep.mubr.f32.mxu0 %v2815_v12  ;;  %v565_v62 = vand.u32 4294901760, %v564_v10  ;;  %v2480_v37 = vsub.f32 %v209_v36, %v2468_v29  ;;  %v2482_v3 = vand.u32 4294901760, %v212_v27  ;;  %v215_v30 = vsel %vm177_vm0, %v157_v51, 0 }
  0x40   : > { %1809 = vmatprep.subr.bf16.mxu0 %v1808_v22  ;;  %v1760_v35 = vpack.c.bf16 %v571_v13, %v559_v31  ;;  %v576_v47 = vsub.f32 %v2450_v0, %v575_v63  ;;  %v1810_v1 = vpack.c.bf16 %v575_v63, %v563_v60  ;;  %v399_v31 = vand.u32 4294901760, %v398_v15  ;;  %v158_v60 = vld [vmem:[%s2261_s17 + $0x68] sm:$0xff] }
  0x41   : > { %v1764_v36 = vpack.c.bf16 %v2233_v32, %v2223_v24  ;;  %v1766_v51 = vpack.c.bf16 %v2252_v38, %v2235_v33  ;;  %v2820_v13 = vand.u32 4294901760, %v2410_v49  ;;  %v409_v10 = vsub.f32 %v2466_v17, %v408_v58  ;;  %v159_v32 = vld [vmem:[%s2261_s17 + $0x70] sm:$0xff] }
  0x42   : > { %378 = vmatmul.mubr.f32.gmra.mrb[12].mxu1 %v377_v19  ;;  %1103 = vmatmul.mubr.f32.gmra.mrb[12].mxu0 %v375_v7  ;;  %v577_v22 = vand.u32 4294901760, %v576_v47  ;;  %v2488_v19 = vand.u32 4294901760, %v215_v30  ;;  %v2500_v63 = vsub.f32 %v212_v27, %v2482_v3  ;;  %v1768_v15 = vpack.c.bf16 %v2263_v41, %v2254_v39  ;;  %v2823_v38 = vld [vmem:[#allocation7_spill] sm:$0xff]  ;;  %v2824_v39 = vld [vmem:[#allocation8_spill] sm:$0xff] }
  0x43   : > { %383 = vmatprep.mubr.f32.mxu1 %v2815_v12  ;;  %1108 = vmatprep.mubr.f32.mxu0 %v2815_v12  ;;  %v1770_v24 = vpack.c.bf16 %v2267_v43, %v2265_v42  ;;  %v410_v27 = vand.u32 4294901760, %v409_v10  ;;  %v1778_v33 = vpack.c.bf16 %v2450_v0, %v2439_v23 }
  0x44   : > { %1761 = vmatprep.subr.bf16.mxu1 %v1760_v35  ;;  %1811 = vmatpush1.bf16.msra.mxu0 %v1810_v1  ;;  %v1762_v7 = vpack.c.bf16 %v577_v22, %v565_v62  ;;  %v419_v1 = vand.u32 4294901760, %v2480_v37  ;;  %v430_v62 = vand.u32 4294901760, %v2500_v63  ;;  %v221_v22 = vsel %vm177_vm0, %v159_v32, 0 }
  0x45   : > { %1813 = vmatprep.subr.bf16.mxu0 %v2191_v16  ;;  %v218_v16 = vsel %vm177_vm0, %v158_v60, 0  ;;  %v160_v60 = vld [vmem:[%s2261_s17 + $0x78] sm:$0xff] }
  0x46   : > { %389 = vmatmul.mubr.f32.gmra.mrb[14].mxu1 %v388_v48  ;;  %1112 = vmatmul.mubr.f32.gmra.mrb[14].mxu0 %v2820_v13  ;;  %v2511_v48 = vsub.f32 %v215_v30, %v2488_v19  ;;  %v420_v35 = vsub.f32 %v2480_v37, %v419_v1  ;;  %v2515_v47 = vand.u32 4294901760, %v218_v16  ;;  %v224_v13 = vsel %vm177_vm0, %v160_v60, 0 }
  0x47   : > { %394 = vmatprep.mubr.f32.mxu1 %v2815_v12  ;;  %1117 = vmatprep.mubr.f32.mxu0 %v2815_v12 }
  0x48   : > { %1763 = vmatpush1.bf16.msra.mxu1 %v1762_v7  ;;  %v441_v30 = vand.u32 4294901760, %v2511_v48  ;;  %v2524_v7 = vsub.f32 %v218_v16, %v2515_v47  ;;  %v2536_v16 = vand.u32 4294901760, %v224_v13 }
  0x49   : > { %1765 = vmatprep.subr.bf16.mxu1 %v1764_v36  ;;  %v2526_v36 = vand.u32 4294901760, %v221_v22 }
  0x4a   : > { %400 = vmatmul.mubr.f32.gmra.mrb[16].mxu1 %v399_v31  ;;  %1121 = vmatmul.mubr.f32.gmra.mrb[16].mxu0 %v397_v5  ;;  %v421_v31 = vand.u32 4294901760, %v420_v35  ;;  %v431_v5 = vsub.f32 %v2500_v63, %v430_v62  ;;  %v442_v10 = vsub.f32 %v2511_v48, %v441_v30 }
  0x4b   : > { %405 = vmatprep.mubr.f32.mxu1 %v2815_v12  ;;  %1126 = vmatprep.mubr.f32.mxu0 %v2815_v12 }
  0x4c   : > { %v432_v32 = vand.u32 4294901760, %v431_v5  ;;  %v443_v35 = vand.u32 4294901760, %v442_v10  ;;  %v1772_v10 = vpack.c.bf16 %v2297_v56, %v2295_v55 }
  0x4e   : > { %411 = vmatmul.mubr.f32.gmra.mrb[18].mxu1 %v410_v27  ;;  %1130 = vmatmul.mubr.f32.gmra.mrb[18].mxu0 %v408_v58  ;;  %v452_v58 = vand.u32 4294901760, %v2524_v7  ;;  %v2534_v27 = vsub.f32 %v221_v22, %v2526_v36 }
  0x4f   : > { %416 = vmatprep.mubr.f32.mxu1 %v2815_v12  ;;  %1135 = vmatprep.mubr.f32.mxu0 %v2815_v12 }
  0x50   : > { %v453_v60 = vsub.f32 %v2524_v7, %v452_v58 }
  0x52   : > { %422 = vmatmul.mubr.f32.gmra.mrb[20].mxu1 %v421_v31  ;;  %1139 = vmatmul.mubr.f32.gmra.mrb[20].mxu0 %v419_v1  ;;  %v463_v31 = vand.u32 4294901760, %v2534_v27  ;;  %v2543_v1 = vsub.f32 %v224_v13, %v2536_v16  ;;  %v454_v22 = vand.u32 4294901760, %v453_v60 }
  0x53   : > { %427 = vmatprep.mubr.f32.mxu1 %v2815_v12  ;;  %1144 = vmatprep.mubr.f32.mxu0 %v2815_v12 }
  0x54   : > { %v464_v5 = vsub.f32 %v2534_v27, %v463_v31 }
  0x56   : > { %433 = vmatmul.mubr.f32.gmra.mrb[22].mxu1 %v432_v32  ;;  %1148 = vmatmul.mubr.f32.gmra.mrb[22].mxu0 %v430_v62  ;;  %v474_v32 = vand.u32 4294901760, %v2543_v1  ;;  %v465_v62 = vand.u32 4294901760, %v464_v5 }
  0x57   : > { %438 = vmatprep.mubr.f32.mxu1 %v2815_v12  ;;  %1153 = vmatprep.mubr.f32.mxu0 %v2815_v12 }
  0x58   : > { %v475_v13 = vsub.f32 %v2543_v1, %v474_v32 }
  0x5a   : > { %444 = vmatmul.mubr.f32.gmra.mrb[24].mxu1 %v443_v35  ;;  %1157 = vmatmul.mubr.f32.gmra.mrb[24].mxu0 %v441_v30  ;;  %v476_v30 = vand.u32 4294901760, %v475_v13 }
  0x5b   : > { %449 = vmatprep.mubr.f32.mxu1 %v2815_v12  ;;  %1162 = vmatprep.mubr.f32.mxu0 %v2815_v12 }
  0x5e   : > { %455 = vmatmul.mubr.f32.gmra.mrb[26].mxu1 %v454_v22  ;;  %1166 = vmatmul.mubr.f32.gmra.mrb[26].mxu0 %v452_v58 }
  0x5f   : > { %460 = vmatprep.mubr.f32.mxu1 %v2815_v12  ;;  %1171 = vmatprep.mubr.f32.mxu0 %v2815_v12 }
  0x62   : > { %466 = vmatmul.mubr.f32.gmra.mrb[28].mxu1 %v465_v62  ;;  %1175 = vmatmul.mubr.f32.gmra.mrb[28].mxu0 %v463_v31 }
  0x63   : > { %471 = vmatprep.mubr.f32.mxu1 %v2815_v12  ;;  %1180 = vmatprep.mubr.f32.mxu0 %v2815_v12 }
  0x66   : > { %477 = vmatmul.mubr.f32.gmra.mrb[30].mxu1 %v476_v30  ;;  %1184 = vmatmul.mubr.f32.gmra.mrb[30].mxu0 %v474_v32 }
  0x67   : > { %627 = vmatprep.mubr.f32.mxu1 %v2815_v12  ;;  %1302 = vmatprep.mubr.f32.mxu0 %v2815_v12 }
  0x6a   : > { %629 = vmatmul.mubr.f32.vlgmr.msra.gmra.mrb[0].mxu1 %v2289_v50  ;;  %1304 = vmatmul.mubr.f32.vlgmr.msra.gmra.mrb[0].mxu0 %v2289_v50 }
  0x6b   : > { %1767 = vmatpush1.bf16.msra.mxu1 %v1766_v51  ;;  %1815 = vmatpush1.bf16.msra.mxu0 %v2208_v20  ;;  %v1774_v20 = vpack.c.bf16 %v2378_v18, %v2367_v14 }
  0x6c   : > { %634 = vmatprep.mubr.f32.mxu1 %v2815_v12  ;;  %1309 = vmatprep.mubr.f32.mxu0 %v2815_v12 }
  0x6d   : > { %1769 = vmatprep.subr.bf16.mxu1 %v1768_v15  ;;  %1817 = vmatprep.subr.bf16.mxu0 %v2210_v21  ;;  %v1776_v21 = vpack.c.bf16 %v2427_v52, %v2422_v9  ;;  %v2821_v9 = vld [vmem:[#allocation5_spill] sm:$0xff] }
  0x6e   : > { %636 = vmatmul.mubr.f32.gmra.mrb[2].mxu1 %v2321_v8  ;;  %1311 = vmatmul.mubr.f32.gmra.mrb[2].mxu0 %v2321_v8 }
  0x6f   : > { %641 = vmatprep.mubr.f32.mxu1 %v2815_v12  ;;  %1316 = vmatprep.mubr.f32.mxu0 %v2815_v12 }
  0x70   : > { %1771 = vmatpush1.bf16.msra.mxu1 %v1770_v24  ;;  %1819 = vmatpush1.bf16.msra.mxu0 %v2239_v34  ;;  %v2822_v34 = vld [vmem:[#allocation6_spill] sm:$0xff] }
  0x71   : > { %1773 = vmatprep.subr.bf16.mxu1 %v1772_v10  ;;  %1821 = vmatprep.subr.bf16.mxu0 %v2256_v40 }
  0x72   : > { %643 = vmatmul.mubr.f32.gmra.mrb[4].mxu1 %v2330_v26  ;;  %1318 = vmatmul.mubr.f32.gmra.mrb[4].mxu0 %v2330_v26 }
  0x73   : > { %648 = vmatprep.mubr.f32.mxu1 %v2815_v12  ;;  %1323 = vmatprep.mubr.f32.mxu0 %v2815_v12 }
  0x74   : > { %1775 = vmatpush1.bf16.msra.mxu1 %v1774_v20  ;;  %1823 = vmatpush1.bf16.msra.mxu0 %v2273_v44 }
  0x75   : > { %1777 = vmatprep.subr.bf16.mxu1 %v1776_v21  ;;  %1825 = vmatprep.subr.bf16.mxu0 %v2282_v46 }
  0x76   : > { %650 = vmatmul.mubr.f32.gmra.mrb[6].mxu1 %v2334_v28  ;;  %1325 = vmatmul.mubr.f32.gmra.mrb[6].mxu0 %v2334_v28 }
  0x77   : > { %655 = vmatprep.mubr.f32.mxu1 %v2815_v12  ;;  %1330 = vmatprep.mubr.f32.mxu0 %v2815_v12 }
  0x78   : > { %1779 = vmatpush1.bf16.msra.mxu1 %v1778_v33  ;;  %1827 = vmatpush1.bf16.msra.mxu0 %v2303_v57 }
  0x7a   : > { %657 = vmatmul.mubr.f32.gmra.mrb[8].mxu1 %v2342_v54  ;;  %1332 = vmatmul.mubr.f32.gmra.mrb[8].mxu0 %v2342_v54 }
  0x7b   : > { %662 = vmatprep.mubr.f32.mxu1 %v2815_v12  ;;  %1337 = vmatprep.mubr.f32.mxu0 %v2815_v12 }
  0x7e   : > { %664 = vmatmul.mubr.f32.gmra.mrb[10].mxu1 %v2382_v2  ;;  %1339 = vmatmul.mubr.f32.gmra.mrb[10].mxu0 %v2382_v2 }
  0x7f   : > { %669 = vmatprep.mubr.f32.mxu1 %v2815_v12  ;;  %1344 = vmatprep.mubr.f32.mxu0 %v2815_v12 }
  0x82   : > { %671 = vmatmul.mubr.f32.gmra.mrb[12].mxu1 %v2393_v6  ;;  %1346 = vmatmul.mubr.f32.gmra.mrb[12].mxu0 %v2393_v6 }
  0x83   : > { %676 = vmatprep.mubr.f32.mxu1 %v2815_v12  ;;  %1351 = vmatprep.mubr.f32.mxu0 %v2815_v12 }
  0x86   : > { %678 = vmatmul.mubr.f32.gmra.mrb[14].mxu1 %v2395_v11  ;;  %1353 = vmatmul.mubr.f32.gmra.mrb[14].mxu0 %v2395_v11 }
  0x87   : > { %683 = vmatprep.mubr.f32.mxu1 %v2815_v12  ;;  %1358 = vmatprep.mubr.f32.mxu0 %v2815_v12 }
  0x8a   : > { %685 = vmatmul.mubr.f32.gmra.mrb[16].mxu1 %v2406_v45  ;;  %1360 = vmatmul.mubr.f32.gmra.mrb[16].mxu0 %v2406_v45 }
  0x8b   : > { %690 = vmatprep.mubr.f32.mxu1 %v2815_v12  ;;  %1365 = vmatprep.mubr.f32.mxu0 %v2815_v12 }
  0x8e   : > { %692 = vmatmul.mubr.f32.gmra.mrb[18].mxu1 %v2445_v61  ;;  %1367 = vmatmul.mubr.f32.gmra.mrb[18].mxu0 %v2445_v61 }
  0x8f   : > { %697 = vmatprep.mubr.f32.mxu1 %v2815_v12  ;;  %1372 = vmatprep.mubr.f32.mxu0 %v2815_v12 }
  0x92   : > { %699 = vmatmul.mubr.f32.gmra.mrb[20].mxu1 %v2468_v29  ;;  %1374 = vmatmul.mubr.f32.gmra.mrb[20].mxu0 %v2468_v29 }
  0x93   : > { %704 = vmatprep.mubr.f32.mxu1 %v2815_v12  ;;  %1379 = vmatprep.mubr.f32.mxu0 %v2815_v12 }
  0x96   : > { %706 = vmatmul.mubr.f32.gmra.mrb[22].mxu1 %v2482_v3  ;;  %1381 = vmatmul.mubr.f32.gmra.mrb[22].mxu0 %v2482_v3 }
  0x97   : > { %711 = vmatprep.mubr.f32.mxu1 %v2815_v12  ;;  %1386 = vmatprep.mubr.f32.mxu0 %v2815_v12 }
  0x9a   : > { %713 = vmatmul.mubr.f32.gmra.mrb[24].mxu1 %v2488_v19  ;;  %1388 = vmatmul.mubr.f32.gmra.mrb[24].mxu0 %v2488_v19 }
  0x9b   : > { %718 = vmatprep.mubr.f32.mxu1 %v2815_v12  ;;  %1393 = vmatprep.mubr.f32.mxu0 %v2815_v12 }
  0x9e   : > { %720 = vmatmul.mubr.f32.gmra.mrb[26].mxu1 %v2515_v47  ;;  %1395 = vmatmul.mubr.f32.gmra.mrb[26].mxu0 %v2515_v47 }
  0x9f   : > { %725 = vmatprep.mubr.f32.mxu1 %v2815_v12  ;;  %1400 = vmatprep.mubr.f32.mxu0 %v2815_v12 }
  0xa2   : > { %727 = vmatmul.mubr.f32.gmra.mrb[28].mxu1 %v2526_v36  ;;  %1402 = vmatmul.mubr.f32.gmra.mrb[28].mxu0 %v2526_v36 }
  0xa3   : > { %732 = vmatprep.mubr.f32.mxu1 %v2815_v12  ;;  %1407 = vmatprep.mubr.f32.mxu0 %v2815_v12 }
  0xa6   : > { %734 = vmatmul.mubr.f32.gmra.mrb[30].mxu1 %v2536_v16  ;;  %1409 = vmatmul.mubr.f32.gmra.mrb[30].mxu0 %v2536_v16 }
  0xa7   : > { %836 = vmatprep.mubr.f32.mxu1 %v2815_v12  ;;  %1495 = vmatprep.mubr.f32.mxu0 %v2815_v12 }
  0xaa   : > { %839 = vmatmul.mubr.f32.vlgmr.msra.gmra.mrb[0].mxu1 %v2307_v59  ;;  %1497 = vmatmul.mubr.f32.vlgmr.msra.gmra.mrb[0].mxu0 %v2289_v50 }
  0xab   : > { %844 = vmatprep.mubr.f32.mxu1 %v2815_v12  ;;  %1502 = vmatprep.mubr.f32.mxu0 %v2815_v12 }
  0xae   : > { %847 = vmatmul.mubr.f32.gmra.mrb[2].mxu1 %v2328_v25  ;;  %1504 = vmatmul.mubr.f32.gmra.mrb[2].mxu0 %v2321_v8 }
  0xaf   : > { %852 = vmatprep.mubr.f32.mxu1 %v2815_v12  ;;  %1509 = vmatprep.mubr.f32.mxu0 %v2815_v12 }
  0xb2   : > { %855 = vmatmul.mubr.f32.gmra.mrb[4].mxu1 %v2340_v53  ;;  %1511 = vmatmul.mubr.f32.gmra.mrb[4].mxu0 %v2330_v26 }
  0xb3   : > { %860 = vmatprep.mubr.f32.mxu1 %v2815_v12  ;;  %1516 = vmatprep.mubr.f32.mxu0 %v2815_v12 }
  0xb6   : > { %863 = vmatmul.mubr.f32.gmra.mrb[6].mxu1 %v2821_v9  ;;  %1518 = vmatmul.mubr.f32.gmra.mrb[6].mxu0 %v2334_v28 }
  0xb7   : > { %868 = vmatprep.mubr.f32.mxu1 %v2815_v12  ;;  %1523 = vmatprep.mubr.f32.mxu0 %v2815_v12 }
  0xba   : > { %871 = vmatmul.mubr.f32.gmra.mrb[8].mxu1 %v2822_v34  ;;  %1525 = vmatmul.mubr.f32.gmra.mrb[8].mxu0 %v2342_v54 }
  0xbb   : > { %876 = vmatprep.mubr.f32.mxu1 %v2815_v12  ;;  %1530 = vmatprep.mubr.f32.mxu0 %v2815_v12 }
  0xbe   : > { %879 = vmatmul.mubr.f32.gmra.mrb[10].mxu1 %v2823_v38  ;;  %1532 = vmatmul.mubr.f32.gmra.mrb[10].mxu0 %v2382_v2 }
  0xbf   : > { %884 = vmatprep.mubr.f32.mxu1 %v2815_v12  ;;  %1537 = vmatprep.mubr.f32.mxu0 %v2815_v12 }
  0xc2   : > { %887 = vmatmul.mubr.f32.gmra.mrb[12].mxu1 %v2824_v39  ;;  %1539 = vmatmul.mubr.f32.gmra.mrb[12].mxu0 %v2393_v6 }
  0xc3   : > { %892 = vmatprep.mubr.f32.mxu1 %v2815_v12  ;;  %1544 = vmatprep.mubr.f32.mxu0 %v2815_v12 }
  0xc6   : > { %895 = vmatmul.mubr.f32.gmra.mrb[14].mxu1 %v2410_v49  ;;  %1546 = vmatmul.mubr.f32.gmra.mrb[14].mxu0 %v2395_v11 }
  0xc7   : > { %900 = vmatprep.mubr.f32.mxu1 %v2815_v12  ;;  %1551 = vmatprep.mubr.f32.mxu0 %v2815_v12 }
  0xca   : > { %903 = vmatmul.mubr.f32.gmra.mrb[16].mxu1 %v2432_v4  ;;  %1553 = vmatmul.mubr.f32.gmra.mrb[16].mxu0 %v2406_v45 }
  0xcb   : > { %908 = vmatprep.mubr.f32.mxu1 %v2815_v12  ;;  %1558 = vmatprep.mubr.f32.mxu0 %v2815_v12 }
  0xce   : > { %911 = vmatmul.mubr.f32.gmra.mrb[18].mxu1 %v2466_v17  ;;  %1560 = vmatmul.mubr.f32.gmra.mrb[18].mxu0 %v2445_v61 }
  0xcf   : > { %916 = vmatprep.mubr.f32.mxu1 %v2815_v12  ;;  %1565 = vmatprep.mubr.f32.mxu0 %v2815_v12 }
  0xd2   : > { %919 = vmatmul.mubr.f32.gmra.mrb[20].mxu1 %v2480_v37  ;;  %1567 = vmatmul.mubr.f32.gmra.mrb[20].mxu0 %v2468_v29 }
  0xd3   : > { %924 = vmatprep.mubr.f32.mxu1 %v2815_v12  ;;  %1572 = vmatprep.mubr.f32.mxu0 %v2815_v12 }
  0xd6   : > { %927 = vmatmul.mubr.f32.gmra.mrb[22].mxu1 %v2500_v63  ;;  %1574 = vmatmul.mubr.f32.gmra.mrb[22].mxu0 %v2482_v3 }
  0xd7   : > { %932 = vmatprep.mubr.f32.mxu1 %v2815_v12  ;;  %1579 = vmatprep.mubr.f32.mxu0 %v2815_v12 }
  0xda   : > { %935 = vmatmul.mubr.f32.gmra.mrb[24].mxu1 %v2511_v48  ;;  %1581 = vmatmul.mubr.f32.gmra.mrb[24].mxu0 %v2488_v19 }
  0xdb   : > { %940 = vmatprep.mubr.f32.mxu1 %v2815_v12  ;;  %1586 = vmatprep.mubr.f32.mxu0 %v2815_v12 }
  0xde   : > { %943 = vmatmul.mubr.f32.gmra.mrb[26].mxu1 %v2524_v7  ;;  %1588 = vmatmul.mubr.f32.gmra.mrb[26].mxu0 %v2515_v47 }
  0xdf   : > { %948 = vmatprep.mubr.f32.mxu1 %v2815_v12  ;;  %1593 = vmatprep.mubr.f32.mxu0 %v2815_v12 }
  0xe2   : > { %951 = vmatmul.mubr.f32.gmra.mrb[28].mxu1 %v2534_v27  ;;  %1595 = vmatmul.mubr.f32.gmra.mrb[28].mxu0 %v2526_v36 }
  0xe3   : > { %956 = vmatprep.mubr.f32.mxu1 %v2815_v12  ;;  %1600 = vmatprep.mubr.f32.mxu0 %v2815_v12 }
  0xe6   : > { %959 = vmatmul.mubr.f32.gmra.mrb[30].mxu1 %v2543_v1  ;;  %1602 = vmatmul.mubr.f32.gmra.mrb[30].mxu0 %v2536_v16 }
 0x17d   : > { %v840_v40 = vpop.f32.mrb[0].mxu1  ;;  %v1498_v41 = vpop.f32.mrb[0].mxu0 }
 0x17e   : > { %v1828_v42 = vadd.f32 %v1498_v41, %v840_v40  ;;  %v842_v43 = vpop.f32.mrb[1].mxu1  ;;  %v1500_v44 = vpop.f32.mrb[1].mxu0 }
 0x17f   : > { %v1829_v46 = vadd.f32 %v1500_v44, %v842_v43 }
 0x180   : > { %1608 = vst [vmem:[%s2711_s22] sm:$0xff] %v1828_v42 }
 0x181   : > { %1609 = vst [vmem:[%s2711_s22 + $0x8] sm:$0xff] %v1829_v46  ;;  %v848_v50 = vpop.f32.mrb[2].mxu1  ;;  %v1505_v55 = vpop.f32.mrb[2].mxu0 }
 0x182   : > { %v1830_v56 = vadd.f32 %v1505_v55, %v848_v50  ;;  %v850_v57 = vpop.f32.mrb[3].mxu1  ;;  %v1507_v59 = vpop.f32.mrb[3].mxu0 }
 0x183   : > { %v1831_v8 = vadd.f32 %v1507_v59, %v850_v57 }
 0x184   : > { %1610 = vst [vmem:[%s2711_s22 + $0x10] sm:$0xff] %v1830_v56 }
 0x185   : > { %1611 = vst [vmem:[%s2711_s22 + $0x18] sm:$0xff] %v1831_v8  ;;  %v856_v25 = vpop.f32.mrb[4].mxu1  ;;  %v1512_v26 = vpop.f32.mrb[4].mxu0 }
 0x186   : > { %v1832_v28 = vadd.f32 %v1512_v26, %v856_v25  ;;  %v858_v53 = vpop.f32.mrb[5].mxu1  ;;  %v1514_v54 = vpop.f32.mrb[5].mxu0 }
 0x187   : > { %v1833_v14 = vadd.f32 %v1514_v54, %v858_v53 }
 0x188   : > { %1612 = vst [vmem:[%s2711_s22 + $0x20] sm:$0xff] %v1832_v28 }
 0x189   : > { %1613 = vst [vmem:[%s2711_s22 + $0x28] sm:$0xff] %v1833_v14  ;;  %v864_v18 = vpop.f32.mrb[6].mxu1  ;;  %v1519_v2 = vpop.f32.mrb[6].mxu0 }
 0x18a   : > { %v1834_v6 = vadd.f32 %v1519_v2, %v864_v18  ;;  %v866_v11 = vpop.f32.mrb[7].mxu1  ;;  %v1521_v45 = vpop.f32.mrb[7].mxu0 }
 0x18b   : > { %v1835_v49 = vadd.f32 %v1521_v45, %v866_v11 }
 0x18c   : > { %1614 = vst [vmem:[%s2711_s22 + $0x30] sm:$0xff] %v1834_v6 }
 0x18d   : > { %1615 = vst [vmem:[%s2711_s22 + $0x38] sm:$0xff] %v1835_v49  ;;  %v872_v52 = vpop.f32.mrb[8].mxu1  ;;  %v1526_v12 = vpop.f32.mrb[8].mxu0 }
 0x18e   : > { %v1836_v4 = vadd.f32 %v1526_v12, %v872_v52  ;;  %v874_v23 = vpop.f32.mrb[9].mxu1  ;;  %v1528_v61 = vpop.f32.mrb[9].mxu0 }
 0x18f   : > { %v1837_v0 = vadd.f32 %v1528_v61, %v874_v23 }
 0x190   : > { %1616 = vst [vmem:[%s2711_s22 + $0x40] sm:$0xff] %v1836_v4 }
 0x191   : > { %1617 = vst [vmem:[%s2711_s22 + $0x48] sm:$0xff] %v1837_v0  ;;  %v880_v17 = vpop.f32.mrb[10].mxu1  ;;  %v1533_v29 = vpop.f32.mrb[10].mxu0 }
 0x192   : > { %v1838_v37 = vadd.f32 %v1533_v29, %v880_v17  ;;  %v882_v3 = vpop.f32.mrb[11].mxu1  ;;  %v1535_v19 = vpop.f32.mrb[11].mxu0 }
 0x193   : > { %v1839_v51 = vadd.f32 %v1535_v19, %v882_v3 }
 0x194   : > { %1618 = vst [vmem:[%s2711_s22 + $0x50] sm:$0xff] %v1838_v37 }
 0x195   : > { %1619 = vst [vmem:[%s2711_s22 + $0x58] sm:$0xff] %v1839_v51  ;;  %v888_v63 = vpop.f32.mrb[12].mxu1  ;;  %v1540_v15 = vpop.f32.mrb[12].mxu0 }
 0x196   : > { %v1840_v24 = vadd.f32 %v1540_v15, %v888_v63  ;;  %v890_v48 = vpop.f32.mrb[13].mxu1  ;;  %v1542_v47 = vpop.f32.mrb[13].mxu0 }
 0x197   : > { %v1841_v7 = vadd.f32 %v1542_v47, %v890_v48 }
 0x198   : > { %1620 = vst [vmem:[%s2711_s22 + $0x60] sm:$0xff] %v1840_v24 }
 0x199   : > { %1621 = vst [vmem:[%s2711_s22 + $0x68] sm:$0xff] %v1841_v7  ;;  %v896_v36 = vpop.f32.mrb[14].mxu1  ;;  %v1547_v58 = vpop.f32.mrb[14].mxu0 }
 0x19a   : > { %v1842_v27 = vadd.f32 %v1547_v58, %v896_v36  ;;  %v898_v16 = vpop.f32.mrb[15].mxu1  ;;  %v1549_v35 = vpop.f32.mrb[15].mxu0 }
 0x19b   : > { %v1843_v60 = vadd.f32 %v1549_v35, %v898_v16 }
 0x19c   : > { %1622 = vst [vmem:[%s2711_s22 + $0x70] sm:$0xff] %v1842_v27 }
 0x19d   : > { %1623 = vst [vmem:[%s2711_s22 + $0x78] sm:$0xff] %v1843_v60  ;;  %v904_v31 = vpop.f32.mrb[16].mxu1  ;;  %v1554_v1 = vpop.f32.mrb[16].mxu0 }
 0x19e   : > { %v1844_v22 = vadd.f32 %v1554_v1, %v904_v31  ;;  %v906_v5 = vpop.f32.mrb[17].mxu1  ;;  %v1556_v32 = vpop.f32.mrb[17].mxu0 }
 0x19f   : > { %v1845_v62 = vadd.f32 %v1556_v32, %v906_v5 }
 0x1a0   : > { %1624 = vst [vmem:[%s2711_s22 + $0x80] sm:$0xff] %v1844_v22 }
 0x1a1   : > { %1625 = vst [vmem:[%s2711_s22 + $0x88] sm:$0xff] %v1845_v62  ;;  %v912_v13 = vpop.f32.mrb[18].mxu1  ;;  %v1561_v30 = vpop.f32.mrb[18].mxu0 }
 0x1a2   : > { %v1846_v10 = vadd.f32 %v1561_v30, %v912_v13  ;;  %v914_v20 = vpop.f32.mrb[19].mxu1  ;;  %v1563_v21 = vpop.f32.mrb[19].mxu0 }
 0x1a3   : > { %v1847_v33 = vadd.f32 %v1563_v21, %v914_v20 }
 0x1a4   : > { %1626 = vst [vmem:[%s2711_s22 + $0x90] sm:$0xff] %v1846_v10 }
 0x1a5   : > { %1627 = vst [vmem:[%s2711_s22 + $0x98] sm:$0xff] %v1847_v33  ;;  %v920_v9 = vpop.f32.mrb[20].mxu1  ;;  %v1568_v34 = vpop.f32.mrb[20].mxu0 }
 0x1a6   : > { %v1848_v38 = vadd.f32 %v1568_v34, %v920_v9  ;;  %v922_v39 = vpop.f32.mrb[21].mxu1  ;;  %v1570_v40 = vpop.f32.mrb[21].mxu0 }
 0x1a7   : > { %v1849_v41 = vadd.f32 %v1570_v40, %v922_v39 }
 0x1a8   : > { %1628 = vst [vmem:[%s2711_s22 + $0xa0] sm:$0xff] %v1848_v38 }
 0x1a9   : > { %1629 = vst [vmem:[%s2711_s22 + $0xa8] sm:$0xff] %v1849_v41  ;;  %v928_v42 = vpop.f32.mrb[22].mxu1  ;;  %v1575_v43 = vpop.f32.mrb[22].mxu0 }
 0x1aa   : > { %v1850_v44 = vadd.f32 %v1575_v43, %v928_v42  ;;  %v930_v46 = vpop.f32.mrb[23].mxu1  ;;  %v1577_v50 = vpop.f32.mrb[23].mxu0 }
 0x1ab   : > { %v1851_v55 = vadd.f32 %v1577_v50, %v930_v46 }
 0x1ac   : > { %1630 = vst [vmem:[%s2711_s22 + $0xb0] sm:$0xff] %v1850_v44 }
 0x1ad   : > { %1631 = vst [vmem:[%s2711_s22 + $0xb8] sm:$0xff] %v1851_v55  ;;  %v936_v56 = vpop.f32.mrb[24].mxu1  ;;  %v1582_v57 = vpop.f32.mrb[24].mxu0 }
 0x1ae   : > { %v1852_v59 = vadd.f32 %v1582_v57, %v936_v56  ;;  %v938_v8 = vpop.f32.mrb[25].mxu1  ;;  %v1584_v25 = vpop.f32.mrb[25].mxu0 }
 0x1af   : > { %v1853_v26 = vadd.f32 %v1584_v25, %v938_v8 }
 0x1b0   : > { %1632 = vst [vmem:[%s2711_s22 + $0xc0] sm:$0xff] %v1852_v59 }
 0x1b1   : > { %1633 = vst [vmem:[%s2711_s22 + $0xc8] sm:$0xff] %v1853_v26  ;;  %v944_v28 = vpop.f32.mrb[26].mxu1  ;;  %v1589_v53 = vpop.f32.mrb[26].mxu0 }
 0x1b2   : > { %v1854_v54 = vadd.f32 %v1589_v53, %v944_v28  ;;  %v946_v14 = vpop.f32.mrb[27].mxu1  ;;  %v1591_v18 = vpop.f32.mrb[27].mxu0 }
 0x1b3   : > { %v1855_v2 = vadd.f32 %v1591_v18, %v946_v14 }
 0x1b4   : > { %1634 = vst [vmem:[%s2711_s22 + $0xd0] sm:$0xff] %v1854_v54 }
 0x1b5   : > { %1635 = vst [vmem:[%s2711_s22 + $0xd8] sm:$0xff] %v1855_v2  ;;  %v952_v6 = vpop.f32.mrb[28].mxu1  ;;  %v1596_v11 = vpop.f32.mrb[28].mxu0 }
 0x1b6   : > { %v1856_v45 = vadd.f32 %v1596_v11, %v952_v6  ;;  %v954_v49 = vpop.f32.mrb[29].mxu1  ;;  %v1598_v52 = vpop.f32.mrb[29].mxu0 }
 0x1b7   : > { %v1857_v12 = vadd.f32 %v1598_v52, %v954_v49 }
 0x1b8   : > { %1636 = vst [vmem:[%s2711_s22 + $0xe0] sm:$0xff] %v1856_v45 }
 0x1b9   : > { %1637 = vst [vmem:[%s2711_s22 + $0xe8] sm:$0xff] %v1857_v12  ;;  %v960_v4 = vpop.f32.mrb[30].mxu1  ;;  %v1603_v23 = vpop.f32.mrb[30].mxu0 }
 0x1ba   : > { %v1858_v61 = vadd.f32 %v1603_v23, %v960_v4  ;;  %v962_v0 = vpop.f32.mrb[31].mxu1  ;;  %v1605_v17 = vpop.f32.mrb[31].mxu0 }
 0x1bb   : > { %v1859_v29 = vadd.f32 %v1605_v17, %v962_v0 }
 0x1bc   : > { %1638 = vst [vmem:[%s2711_s22 + $0xf0] sm:$0xff] %v1858_v61 }
 0x1bd   : > { %1639 = vst [vmem:[%s2711_s22 + $0xf8] sm:$0xff] %v1859_v29 }
 0x1be   : > { %2043 = shalt.err (!%p2040_p3)
}
 0x1bf   : > { %s2044_s5 = scalar_lea.hbm %s2748_s28, 4096  ;;  %s2048_s8 = scalar_lea.hbm %s2799_s2, 8192 }
 0x1c0   : > { %p2045_p4 = scmp.ne.s32.totalorder %s2748_s28, %s2044_s5  ;;  %p2049_p9 = scmp.lt.u32.totalorder %s2748_s28, %s2799_s2 }
 0x1c1   : > { %p2050_p10 = scmp.lt.u32.totalorder %s2048_s8, %s2044_s5  ;;  %p2052_p12 = scmp.lt.u32.totalorder %s2044_s5, %s2748_s28 }
 0x1c2   : > { %p2046_p7 = pnand %p2045_p4, %p2151_p5 }
 0x1c3   : > { %p2051_p11 = por %p2050_p10, %p2049_p9 }
 0x1c4   : > { %p2047_p8 = pneg %p2046_p7 }
 0x1c5   : > { %p2053_p13 = por %p2052_p12, %p2051_p11 }
 0x1c7   : > { %p2054_p0 = pnand %p2053_p13, %p2047_p8 }
 0x1c9   : > { %2057 = shalt.err (!%p2054_p0)
}
 0x1ca   : > { %s2096_s17 = smov 256   ;;  %s2097_s27 = smov 16  }
 0x1cb   : > { %1988 = dma.vmem_to_hbm [thread:$0]  (%p2151_p5), %s2750_s24, 4096, %s2748_s28, %s2756_s13, %s2096_s17, %s2096_s17, %s2097_s27  }
 0x1cc PF: > { %p1994_p1 = scmp.ge.s32.totalorder %s2092_s12, 2  ;;  %s1670_s21 = sand.u32 1, %s2080_s9  }
 0x1cd   : > { %s1671_s22 = scalar_lea.sflag [#allocation3], %s1670_s21 }
 0x1ce   : > { %p1991_p2 = pnand %p1994_p1, %p2155_p6 }
 0x1d0   : > { %2075 = dma.done.wait (!%p1991_p2), %s1671_s22, 4096  }
 0x1d1   : > { %2077 = vsyncadd (!%p1991_p2), %s1671_s22, 4294963200  ;;  %p12_p3 = scmp.ge.s32.totalorder %s2138_s15, 4   ;;  %s2825_s9 = smov %s2084_s10 }
 0x1d2   : > { %s2826_s10 = smov %s2088_s11  ;;  %s2827_s11 = smov %s2149_s18 }
 0x1d3   : > { %s2828_s12 = smov %s2138_s15  ;;  %14 = sbr.rel (!%p12_p3) target bundleno = 3 (0x3), region = 63 }
 0x1da   :  { %1676 = vsyncpa [#allocation3], 1 }
 0x1db   :  { %1678 = vsyncpa [#allocation3 + $0x1], 1 }

</bundles_post_ra>
